<compile_context>
chip_gen: v6e
topology: v6e:2x2x1
jax: 0.10.0
libtpu: 0.0.40
codegen_flags: <defaults>
</compile_context>

<pallas_src>
import math

import jax
import jax.numpy as jnp
from jax.experimental import pallas as pl
from jax.experimental.pallas import tpu as pltpu


# ~4 MiB per block -> in+out double-buffered ~16 MiB VMEM; portable to v7x
# (32 MiB scoped default) and sits in the flat part of the tile-size curve.
_TARGET_BLOCK_BYTES = 4 * 1024 * 1024


def _copy_kernel(x_ref, o_ref):
    # Identity copy of the current lane-dense tile (full-width unmasked vst).
    o_ref[...] = x_ref[...]


def _pick_slab(total_elems):
    """Pick a lane-dense 2D slab (rows, lane) with lane a large multiple of 128.

    Prefers the widest lane that still leaves >= 8 rows (full sublanes);
    falls back to the widest dividing lane, or None if 128 doesn't divide.
    """
    best = None
    for lane in (8192, 4096, 2048, 1024, 512, 256, 128):
        if total_elems % lane == 0:
            if best is None:
                best = lane
            if total_elems // lane >= 8:
                return total_elems // lane, lane
    if best is not None:
        return total_elems // best, best
    return None


def unflatten(x, ndims):
    """Pallas equivalent of Unflatten(ndims).forward(x).

    x: (B, ...) with prod(x.shape[1:]) == prod(ndims).  Returns (B, *ndims).
    """
    B = x.shape[0]
    F = math.prod(x.shape[1:])
    assert F == math.prod(ndims), "feature dim must equal prod(ndims)"

    total = B * F
    itemsize = jnp.dtype(x.dtype).itemsize

    slab_dims = _pick_slab(total)
    if slab_dims is None:
        # Odd sizes: single full-array block (block == full array dims
        # satisfies the (8, 128) tiling rule regardless of divisibility).
        rows, cols = B, F
        tb = rows
    else:
        rows, cols = slab_dims
        max_rows = max(1, _TARGET_BLOCK_BYTES // (cols * itemsize))
        if rows <= 8 or rows <= max_rows:
            tb = rows                          # whole slab in one block
        else:
            tb = max(8, (max_rows // 8) * 8)   # multiple of 8 sublanes

    slab = x.reshape(rows, cols)               # metadata-only
    grid = (pl.cdiv(rows, tb),)

    flat_out = pl.pallas_call(
        _copy_kernel,
        out_shape=jax.ShapeDtypeStruct((rows, cols), x.dtype),
        grid_spec=pltpu.PrefetchScalarGridSpec(
            num_scalar_prefetch=0,
            grid=grid,
            in_specs=[pl.BlockSpec((tb, cols), lambda i: (i, 0))],
            out_specs=pl.BlockSpec((tb, cols), lambda i: (i, 0)),
        ),
        # Identity copy: write into the input's buffer instead of allocating
        # a second HBM array (takes effect when the caller donates the input).
        input_output_aliases={0: 0},
        cost_estimate=pl.CostEstimate(
            flops=0,
            transcendentals=0,
            bytes_accessed=2 * total * itemsize,
        ),
        compiler_params=pltpu.CompilerParams(
            dimension_semantics=("parallel",),   # 2 TCs on v7x split the grid
        ),
    )(slab)

    # Pure metadata reshape (glue), matches torch .view exactly.
    return flat_out.reshape((B, *ndims))


if __name__ == "__main__":
    # Module has no parameters (only `ndims`); nothing to initialize.
    ndims = (4, 16, 16)          # (C, H, W) -> flat feature size 1024
    B = 2
    F = math.prod(ndims)

    key = jax.random.PRNGKey(0)
    x = jax.random.normal(key, (B, F), dtype=jnp.float32)

    ref = x.reshape((B, *ndims))              # reference .view semantics
    y = jax.block_until_ready(unflatten(x, ndims))

    assert y.shape == (B, *ndims)
    assert y.dtype == x.dtype
    assert bool(jnp.all(y == ref))

    print("KERNEL_OK")
</pallas_src>

<mosaic_0001>
module attributes {stable_mosaic.version = 11 : i64} {
  func.func @_copy_kernel(%arg0: i32, %arg1: memref<8x256xf32, #tpu.memory_space<vmem>>, %arg2: memref<8x256xf32, #tpu.memory_space<vmem>>) attributes {dimension_semantics = [#tpu.dimension_semantics<parallel>], iteration_bounds = array<i64: 1>, scalar_prefetch = 0 : i64, scratch_operands = 0 : i64, tpu.core_type = #tpu.core_type<tc>, window_params = [{transform_indices = @transform_0, window_bounds = array<i64: 8, 256>}, {transform_indices = @transform_1, window_bounds = array<i64: 8, 256>}]} {
    %c0 = arith.constant 0 : index
    %c0_0 = arith.constant 0 : index
    %0 = vector.load %arg1[%c0, %c0_0] : memref<8x256xf32, #tpu.memory_space<vmem>>, vector<8x256xf32>
    %c0_1 = arith.constant 0 : index
    %c0_2 = arith.constant 0 : index
    %1 = vector.load %arg2[%c0_1, %c0_2] : memref<8x256xf32, #tpu.memory_space<vmem>>, vector<8x256xf32>
    tpu.vector_store %arg2[%c0_1, %c0_2], %0 {strides = array<i32>} : memref<8x256xf32, #tpu.memory_space<vmem>>, vector<8x256xf32>,
    return
  }
  func.func @transform_0(%arg0: i32) -> (i32, i32) {
    %c0_i32 = arith.constant 0 : i32
    %c0_i32_0 = arith.constant 0 : i32
    return %arg0, %c0_i32 : i32, i32
  }
  func.func @transform_1(%arg0: i32) -> (i32, i32) {
    %c0_i32 = arith.constant 0 : i32
    %c0_i32_0 = arith.constant 0 : i32
    return %arg0, %c0_i32 : i32, i32
  }
}

</mosaic_0001>

<bundles_post_ra>
// kernel: tpu_custom_call.1
= control target key start
LH: loop header
LB: loop body
LE: loop exit
PB: predicated region body
PF: predicated region fallthrough
CT: control target
= control target key end

     0   :  { %6 = vsyncpa [#allocation3], 0  ;;  %s104_s0 = inlined_call_operand.hbm [shape: f32[8,256], index: 0, kind: input, shape index: {}, may-alias: {0,1}]   ;;  %s105_s1 = inlined_call_operand.hbm [shape: f32[8,256], index: 1, kind: output, shape index: {}, may-alias: {0,1}]  }
   0x1   :  { %7 = vsyncpa [#allocation4], 0  ;;  %s86_s6 = smov [#allocation2]  }
   0x2   :  { %s14_s7 = sshll.u32 %s86_s6, 4  ;;  %s15_s7 = int_to_ptr.vmem [resolvable:$true] %s14_s7 }
   0x3   :  { %s50_s8 = scalar_lea.vmem %s15_s7, 256  ;;  %p55_p1 = scmp.lt.s32.totalorder %s15_s7, %s15_s7 }
   0x4   :  { %p51_p0 = scmp.ne.s32.totalorder %s15_s7, %s50_s8  ;;  %p56_p2 = scmp.lt.s32.totalorder %s50_s8, %s50_s8 }
   0x6   :  { %p57_p3 = por %p56_p2, %p55_p1 }
   0x8   :  { %p58_p4 = pnand %p57_p3, %p51_p0 }
   0xa   :  { %61 = shalt.err (!%p58_p4)
}
   0xb   :  { %17 = dma.hbm_to_vmem [thread:$0]  %s104_s0, 256, %s15_s7, [#allocation3]  }
   0xc   :  { %82 = dma.done.wait [#allocation3], 256  }
   0xd   :  { %83 = vsyncadd [#allocation3], 4294967040  ;;  %s87_s11 = smov [#allocation5]   ;;  %v21_v0 = vld [vmem:[#allocation2] sm:$0xff]  ;;  %v22_v1 = vld [vmem:[#allocation2 + $0x8] sm:$0xff] }
   0xe   :  { %s31_s12 = sshll.u32 %s87_s11, 4  ;;  %23 = vst [vmem:[#allocation5] sm:$0xff] %v21_v0  ;;  %24 = vst [vmem:[#allocation5 + $0x8] sm:$0xff] %v22_v1  ;;  %s32_s12 = int_to_ptr.vmem [resolvable:$true] %s31_s12 }
   0xf   :  { %s62_s13 = scalar_lea.vmem %s32_s12, 256  ;;  %p67_p6 = scmp.lt.s32.totalorder %s32_s12, %s32_s12 }
  0x10   :  { %p63_p5 = scmp.ne.s32.totalorder %s32_s12, %s62_s13  ;;  %p68_p7 = scmp.lt.s32.totalorder %s62_s13, %s62_s13 }
  0x12   :  { %p69_p8 = por %p68_p7, %p67_p6 }
  0x14   :  { %p70_p9 = pnand %p69_p8, %p63_p5 }
  0x16   :  { %73 = shalt.err (!%p70_p9)
}
  0x17   :  { %34 = dma.vmem_to_hbm [thread:$0]  %s32_s12, 256, %s105_s1, [#allocation4]  }
  0x18   :  { %84 = dma.done.wait [#allocation4], 256  }
  0x19   :  { %85 = vsyncadd [#allocation4], 4294967040 }
  0x1a   :  { %38 = vsyncpa [#allocation3], 1 }
  0x1b   :  { %39 = vsyncpa [#allocation4], 1 }

</bundles_post_ra>
